<compile_context>
chip_gen: v7x
topology: tpu7x:2x2x1
jax: 0.10.0
libtpu: 0.0.40
codegen_flags: <defaults>
</compile_context>

<pallas_src>
import jax
import jax.numpy as jnp
from jax import lax
from jax.experimental import pallas as pl
from jax.experimental.pallas import tpu as pltpu


# --------------------------------------------------------------------------- #
# Phase 1: per-layer masked mean pooling, pipelined over (layer, seq-chunk).
# --------------------------------------------------------------------------- #
def mean_pool_kernel(mask_ref, hs_ref, pooled_ref, msum_ref):
    """One (layer, seq-chunk) grid step of the masked mean.

    mask_ref:   (B, S_CHUNK)       attention-mask chunk (any float/int dtype)
    hs_ref:     (1, B, S_CHUNK, H) hidden-state chunk of layer l, native dtype
    pooled_ref: (1, B, H) f32      resident output block for layer l (accumulator)
    msum_ref:   (B, 1)   f32       VMEM scratch: running sum of the mask
    """
    s = pl.program_id(1)

    @pl.when(s == 0)
    def _init():
        pooled_ref[0] = jnp.zeros_like(pooled_ref[0])
        msum_ref[...] = jnp.zeros_like(msum_ref)

    mask = mask_ref[...].astype(jnp.float32)            # (B, S_CHUNK)
    x = hs_ref[0].astype(jnp.float32)                   # (B, S_CHUNK, H)

    # VPU mask-multiply + cross-sublane sum; stays hidden under the HBM DMA
    # (keeps the MXU out of Phase 1 entirely).
    pooled_ref[0] += jnp.sum(x * mask[:, :, None], axis=1)          # (B, H)
    msum_ref[...] += jnp.sum(mask, axis=1, keepdims=True)           # (B, 1)

    @pl.when(s == pl.num_programs(1) - 1)
    def _finalize():
        # clamp_min = 0.0 to match MeanPooling(0.0); an all-masked row gives
        # inf, exactly as in the PyTorch module. Exact division (not approx
        # reciprocal) for numerical parity — it is off the critical path.
        sum_mask = jnp.maximum(msum_ref[...], 0.0)
        pooled_ref[0] = pooled_ref[0] / sum_mask


# --------------------------------------------------------------------------- #
# Phase 2: tiny serial LSTM recurrence over the L pooled vectors.
# --------------------------------------------------------------------------- #
def make_lstm_recurrence_kernel(L, B, H):
    def kernel(pooled_ref, wih_ref, whh_ref, b_ref, out_ref):
        """PyTorch nn.LSTM (1 layer, unidirectional) over the layer axis.

        pooled_ref: (L*B, H) f32   pooled per-layer embeddings (the "sequence")
        wih_ref:    (H, 4H) bf16   W_ih^T, gate columns reordered (i, f, o, g)
        whh_ref:    (H, 4H) bf16   W_hh^T, same gate order
        b_ref:      (1, 4H) f32    b_ih + b_hh, same gate order
        out_ref:    (B, H)  f32    last time-step hidden state (== out[:, -1, :])
        """
        wih = wih_ref[...]
        whh = whh_ref[...]
        b = b_ref[...]

        # Hoisted input projection: one well-shaped MXU matmul with M = L*B
        # (bf16 operands, f32 accumulation). Only h @ W_hh remains serial.
        x_all = pooled_ref[...].astype(jnp.bfloat16)               # (L*B, H)
        gx = jnp.dot(x_all, wih, preferred_element_type=jnp.float32) + b  # (L*B, 4H)

        h = jnp.zeros((B, H), jnp.float32)
        c = jnp.zeros((B, H), jnp.float32)

        # L is small and static: unroll so the LLO scheduler can overlap the
        # next step's weight push with this step's EUP sigmoid/tanh chain.
        # TODO(synk): hold W_hh resident in the MXU via pltpu.matmul_push_rhs /
        # matmul_acc_lhs / matmul_pop to avoid re-pushing the weights L times.
        for l in range(L):
            gates = gx[l * B:(l + 1) * B] + jnp.dot(
                h.astype(jnp.bfloat16), whh, preferred_element_type=jnp.float32)
            # Gate order (i, f, o, g): one EUP sigmoid over a contiguous slab.
            sig = jax.nn.sigmoid(gates[:, 0:3 * H])                 # (B, 3H)
            i_g = sig[:, 0:H]
            f_g = sig[:, H:2 * H]
            o_g = sig[:, 2 * H:3 * H]
            g_g = jnp.tanh(gates[:, 3 * H:4 * H])
            c = f_g * c + i_g * g_g
            h = o_g * jnp.tanh(c)

        out_ref[...] = h

    return kernel


# --------------------------------------------------------------------------- #
# Wrapper
# --------------------------------------------------------------------------- #
def lstm_pooling(all_hidden_states, mask, w_ih, w_hh, b_ih, b_hh,
                 num_hidden_layers=12, s_chunk=128):
    """all_hidden_states: (L_total, B, S, H); mask: (B, S).

    w_ih, w_hh: (4H, H) PyTorch nn.LSTM weights (gate order i, f, g, o);
    b_ih, b_hh: (4H,) biases. Returns (B, H) float32, matching
    LSTMPooling.forward of the PyTorch module.
    """
    L_total, B, S, H = all_hidden_states.shape
    L = num_hidden_layers
    assert 0 < L <= L_total
    layer_offset = L_total - L          # folded into the index_map (no HBM copy)

    # ---- Phase 1: masked mean per layer, pipelined over (L, S-chunks) -------
    # S_CHUNK must be a multiple of 128 (mask block lane dim) unless it covers
    # the whole sequence; fall back to a single chunk otherwise.
    if s_chunk >= S or S % s_chunk != 0 or s_chunk % 128 != 0:
        s_chunk = S
    num_s = S // s_chunk

    pooled_all = pl.pallas_call(
        mean_pool_kernel,
        out_shape=jax.ShapeDtypeStruct((L, B, H), jnp.float32),
        grid=(L, num_s),
        in_specs=[
            # mask chunk (layer-invariant)
            pl.BlockSpec((B, s_chunk), lambda l, s: (0, s)),
            # hidden-state chunk of layer (l + layer_offset); the full tensor is
            # passed in, only the last L layers are ever DMA'd.
            pl.BlockSpec((1, B, s_chunk, H),
                         lambda l, s: (l + layer_offset, 0, s, 0)),
        ],
        # Output block index is constant over the s axis -> resident accumulator.
        out_specs=pl.BlockSpec((1, B, H), lambda l, s: (l, 0, 0)),
        scratch_shapes=[pltpu.VMEM((B, 1), jnp.float32)],
        compiler_params=pltpu.CompilerParams(
            # TODO(synk): on v7x use CORE_PARALLEL (or pl.core_map) to actually
            # split the layer axis across the two TensorCores.
            dimension_semantics=("parallel", "arbitrary")),
    )(mask, all_hidden_states)

    # ---- Phase 2: serial LSTM recurrence over the L pooled vectors ----------
    def reorder_gates(w4h):
        # PyTorch gate order (i, f, g, o) -> (i, f, o, g) along the 4H axis.
        i, f, g, o = jnp.split(w4h, 4, axis=0)
        return jnp.concatenate([i, f, o, g], axis=0)

    wih_t = jnp.transpose(reorder_gates(w_ih)).astype(jnp.bfloat16)   # (H, 4H)
    whh_t = jnp.transpose(reorder_gates(w_hh)).astype(jnp.bfloat16)   # (H, 4H)
    bias = reorder_gates((b_ih + b_hh)[:, None]).reshape(1, 4 * H)
    bias = bias.astype(jnp.float32)

    pooled2d = pooled_all.reshape(L * B, H)   # tiny (L*B, H) metadata reshape

    vmem = pl.BlockSpec(memory_space=pltpu.MemorySpace.VMEM)
    return pl.pallas_call(
        make_lstm_recurrence_kernel(L, B, H),
        out_shape=jax.ShapeDtypeStruct((B, H), jnp.float32),
        in_specs=[vmem, vmem, vmem, vmem],
        out_specs=vmem,
    )(pooled2d, wih_t, whh_t, bias)


# --------------------------------------------------------------------------- #
# Pure-JAX reference (mirrors the PyTorch module) for a sanity check.
# --------------------------------------------------------------------------- #
def lstm_pooling_reference(all_hidden_states, mask, w_ih, w_hh, b_ih, b_hh, L):
    hs = all_hidden_states[-L:].astype(jnp.float32)                # (L, B, S, H)
    m = mask.astype(jnp.float32)                                   # (B, S)
    H = hs.shape[-1]
    summed = jnp.einsum('lbsh,bs->lbh', hs, m)
    cnt = jnp.maximum(jnp.sum(m, axis=1), 0.0)[None, :, None]
    pooled = summed / cnt                                          # (L, B, H)

    def cell(carry, x):
        h, c = carry
        gates = x @ w_ih.T + b_ih + h @ w_hh.T + b_hh
        i = jax.nn.sigmoid(gates[:, 0:H])
        f = jax.nn.sigmoid(gates[:, H:2 * H])
        g = jnp.tanh(gates[:, 2 * H:3 * H])
        o = jax.nn.sigmoid(gates[:, 3 * H:4 * H])
        c = f * c + i * g
        h = o * jnp.tanh(c)
        return (h, c), None

    B = hs.shape[1]
    (h_last, _), _ = lax.scan(
        cell, (jnp.zeros((B, H), jnp.float32), jnp.zeros((B, H), jnp.float32)),
        pooled)
    return h_last


if __name__ == "__main__":
    # Small shapes; L_total = L + 1 so the layer-offset index_map is exercised.
    B, S, H, L = 2, 16, 32, 12
    L_total = L + 1

    key = jax.random.PRNGKey(0)
    k1, k2, k3, k4, k5, k6 = jax.random.split(key, 6)

    all_hidden_states = jax.random.normal(k1, (L_total, B, S, H), jnp.float32)
    mask = (jax.random.uniform(k2, (B, S)) > 0.3).astype(jnp.float32)
    mask = mask.at[:, 0].set(1.0)   # guarantee >= 1 valid token per row

    # PyTorch nn.LSTM parameter shapes, uniform init.
    bound = 1.0 / (H ** 0.5)
    w_ih = jax.random.uniform(k3, (4 * H, H), jnp.float32, -bound, bound)
    w_hh = jax.random.uniform(k4, (4 * H, H), jnp.float32, -bound, bound)
    b_ih = jax.random.uniform(k5, (4 * H,), jnp.float32, -bound, bound)
    b_hh = jax.random.uniform(k6, (4 * H,), jnp.float32, -bound, bound)

    out = lstm_pooling(all_hidden_states, mask, w_ih, w_hh, b_ih, b_hh, L)
    out = jax.block_until_ready(out)
    assert out.shape == (B, H)
    assert bool(jnp.all(jnp.isfinite(out)))

    ref = lstm_pooling_reference(all_hidden_states, mask, w_ih, w_hh,
                                 b_ih, b_hh, L)
    # Loose tolerance: the kernel uses bf16 weights / bf16 MXU operands with
    # f32 accumulation, the reference is pure f32.
    max_err = float(jnp.max(jnp.abs(out - ref)))
    assert max_err < 5e-2, f"max abs error {max_err}"

    print("KERNEL_OK")
</pallas_src>

<mosaic_0001>
module attributes {stable_mosaic.version = 11 : i64} {
  func.func @mean_pool_kernel(%arg0: i32, %arg1: i32, %arg2: memref<2x16xf32, #tpu.memory_space<vmem>>, %arg3: memref<1x2x16x32xf32, #tpu.memory_space<vmem>>, %arg4: memref<1x2x32xf32, #tpu.memory_space<vmem>>, %arg5: memref<2x1xf32, #tpu.memory_space<vmem>>) attributes {dimension_semantics = [#tpu.dimension_semantics<parallel>, #tpu.dimension_semantics<arbitrary>], iteration_bounds = array<i64: 12, 1>, scalar_prefetch = 0 : i64, scratch_operands = 1 : i64, tpu.core_type = #tpu.core_type<tc>, window_params = [{transform_indices = @transform_0, window_bounds = array<i64: 2, 16>}, {transform_indices = @transform_1, window_bounds = array<i64: 1, 2, 16, 32>}, {transform_indices = @transform_2, window_bounds = array<i64: 1, 2, 32>}]} {
    %c0_i32 = arith.constant 0 : i32
    %0 = arith.cmpi eq, %arg1, %c0_i32 : i32
    %1 = arith.extui %0 : i1 to i32
    %c0_i32_0 = arith.constant 0 : i32
    %2 = arith.cmpi ne, %1, %c0_i32_0 : i32
    scf.if %2 {
      %cst_19 = arith.constant 0.000000e+00 : f32
      %24 = vector.broadcast %cst_19 : f32 to vector<2x32xf32>
      %c0_20 = arith.constant 0 : index
      %c0_21 = arith.constant 0 : index
      %c0_22 = arith.constant 0 : index
      %25 = vector.load %arg4[%c0_20, %c0_21, %c0_22] : memref<1x2x32xf32, #tpu.memory_space<vmem>>, vector<1x2x32xf32>
      %26 = vector.shape_cast %25 : vector<1x2x32xf32> to vector<2x32xf32>
      %27 = vector.shape_cast %24 : vector<2x32xf32> to vector<1x2x32xf32>
      tpu.vector_store %arg4[%c0_20, %c0_21, %c0_22], %27 {strides = array<i32>} : memref<1x2x32xf32, #tpu.memory_space<vmem>>, vector<1x2x32xf32>,
      %cst_23 = arith.constant 0.000000e+00 : f32
      %28 = vector.broadcast %cst_23 : f32 to vector<2x1xf32>
      %c0_24 = arith.constant 0 : index
      %c0_25 = arith.constant 0 : index
      %29 = vector.load %arg5[%c0_24, %c0_25] : memref<2x1xf32, #tpu.memory_space<vmem>>, vector<2x1xf32>
      tpu.vector_store %arg5[%c0_24, %c0_25], %28 {strides = array<i32>} : memref<2x1xf32, #tpu.memory_space<vmem>>, vector<2x1xf32>,
    } else {
    }
    %c0 = arith.constant 0 : index
    %c0_1 = arith.constant 0 : index
    %3 = vector.load %arg2[%c0, %c0_1] : memref<2x16xf32, #tpu.memory_space<vmem>>, vector<2x16xf32>
    %c0_2 = arith.constant 0 : index
    %c0_3 = arith.constant 0 : index
    %c0_4 = arith.constant 0 : index
    %c0_5 = arith.constant 0 : index
    %4 = vector.load %arg3[%c0_2, %c0_3, %c0_4, %c0_5] : memref<1x2x16x32xf32, #tpu.memory_space<vmem>>, vector<1x2x16x32xf32>
    %5 = vector.shape_cast %4 : vector<1x2x16x32xf32> to vector<2x16x32xf32>
    %c0_6 = arith.constant 0 : index
    %c0_7 = arith.constant 0 : index
    %c0_8 = arith.constant 0 : index
    %6 = vector.load %arg4[%c0_6, %c0_7, %c0_8] : memref<1x2x32xf32, #tpu.memory_space<vmem>>, vector<1x2x32xf32>
    %7 = vector.shape_cast %6 : vector<1x2x32xf32> to vector<2x32xf32>
    %8 = vector.shape_cast %3 : vector<2x16xf32> to vector<2x16x1xf32>
    %9 = vector.broadcast %8 : vector<2x16x1xf32> to vector<2x16x32xf32>
    %10 = arith.mulf %5, %9 : vector<2x16x32xf32>
    %cst = arith.constant dense<0.000000e+00> : vector<2x32xf32>
    %11 = vector.multi_reduction <add>, %10, %cst [1] : vector<2x16x32xf32> to vector<2x32xf32>
    %12 = arith.addf %7, %11 : vector<2x32xf32>
    %c0_9 = arith.constant 0 : index
    %c0_10 = arith.constant 0 : index
    %c0_11 = arith.constant 0 : index
    %13 = vector.load %arg4[%c0_9, %c0_10, %c0_11] : memref<1x2x32xf32, #tpu.memory_space<vmem>>, vector<1x2x32xf32>
    %14 = vector.shape_cast %13 : vector<1x2x32xf32> to vector<2x32xf32>
    %15 = vector.shape_cast %12 : vector<2x32xf32> to vector<1x2x32xf32>
    tpu.vector_store %arg4[%c0_9, %c0_10, %c0_11], %15 {strides = array<i32>} : memref<1x2x32xf32, #tpu.memory_space<vmem>>, vector<1x2x32xf32>,
    %c0_12 = arith.constant 0 : index
    %c0_13 = arith.constant 0 : index
    %16 = vector.load %arg5[%c0_12, %c0_13] : memref<2x1xf32, #tpu.memory_space<vmem>>, vector<2x1xf32>
    %cst_14 = arith.constant dense<0.000000e+00> : vector<2xf32>
    %17 = vector.multi_reduction <add>, %3, %cst_14 [1] : vector<2x16xf32> to vector<2xf32>
    %18 = vector.shape_cast %17 : vector<2xf32> to vector<2x1xf32>
    %19 = arith.addf %16, %18 : vector<2x1xf32>
    %c0_15 = arith.constant 0 : index
    %c0_16 = arith.constant 0 : index
    %20 = vector.load %arg5[%c0_15, %c0_16] : memref<2x1xf32, #tpu.memory_space<vmem>>, vector<2x1xf32>
    tpu.vector_store %arg5[%c0_15, %c0_16], %19 {strides = array<i32>} : memref<2x1xf32, #tpu.memory_space<vmem>>, vector<2x1xf32>,
    %c0_i32_17 = arith.constant 0 : i32
    %21 = arith.cmpi eq, %arg1, %c0_i32_17 : i32
    %22 = arith.extui %21 : i1 to i32
    %c0_i32_18 = arith.constant 0 : i32
    %23 = arith.cmpi ne, %22, %c0_i32_18 : i32
    scf.if %23 {
      %c0_19 = arith.constant 0 : index
      %c0_20 = arith.constant 0 : index
      %24 = vector.load %arg5[%c0_19, %c0_20] : memref<2x1xf32, #tpu.memory_space<vmem>>, vector<2x1xf32>
      %cst_21 = arith.constant 0.000000e+00 : f32
      %25 = vector.broadcast %cst_21 : f32 to vector<2x1xf32>
      %26 = arith.maximumf %24, %25 : vector<2x1xf32>
      %c0_22 = arith.constant 0 : index
      %c0_23 = arith.constant 0 : index
      %c0_24 = arith.constant 0 : index
      %27 = vector.load %arg4[%c0_22, %c0_23, %c0_24] : memref<1x2x32xf32, #tpu.memory_space<vmem>>, vector<1x2x32xf32>
      %28 = vector.shape_cast %27 : vector<1x2x32xf32> to vector<2x32xf32>
      %29 = vector.broadcast %26 : vector<2x1xf32> to vector<2x32xf32>
      %30 = arith.divf %28, %29 : vector<2x32xf32>
      %c0_25 = arith.constant 0 : index
      %c0_26 = arith.constant 0 : index
      %c0_27 = arith.constant 0 : index
      %31 = vector.load %arg4[%c0_25, %c0_26, %c0_27] : memref<1x2x32xf32, #tpu.memory_space<vmem>>, vector<1x2x32xf32>
      %32 = vector.shape_cast %31 : vector<1x2x32xf32> to vector<2x32xf32>
      %33 = vector.shape_cast %30 : vector<2x32xf32> to vector<1x2x32xf32>
      tpu.vector_store %arg4[%c0_25, %c0_26, %c0_27], %33 {strides = array<i32>} : memref<1x2x32xf32, #tpu.memory_space<vmem>>, vector<1x2x32xf32>,
    } else {
    }
    return
  }
  func.func @transform_0(%arg0: i32, %arg1: i32) -> (i32, i32) {
    %c0_i32 = arith.constant 0 : i32
    %c0_i32_0 = arith.constant 0 : i32
    return %c0_i32, %arg1 : i32, i32
  }
  func.func @transform_1(%arg0: i32, %arg1: i32) -> (i32, i32, i32, i32) {
    %c1_i32 = arith.constant 1 : i32
    %0 = arith.addi %arg0, %c1_i32 : i32
    %c0_i32 = arith.constant 0 : i32
    %c0_i32_0 = arith.constant 0 : i32
    %c0_i32_1 = arith.constant 0 : i32
    return %0, %c0_i32, %arg1, %c0_i32_0 : i32, i32, i32, i32
  }
  func.func @transform_2(%arg0: i32, %arg1: i32) -> (i32, i32, i32) {
    %c0_i32 = arith.constant 0 : i32
    %c0_i32_0 = arith.constant 0 : i32
    %c0_i32_1 = arith.constant 0 : i32
    return %arg0, %c0_i32, %c0_i32_0 : i32, i32, i32
  }
}

</mosaic_0001>

<bundles_post_ra>
// kernel: tpu_custom_call.1
= control target key start
LH: loop header
LB: loop body
LE: loop exit
PB: predicated region body
PF: predicated region fallthrough
CT: control target
= control target key end

     0   :  { %s986_s0 = inlined_call_operand.hbm [shape: f32[2,16], index: 0, kind: input, shape index: {}]   ;;  %s987_s1 = inlined_call_operand.hbm [shape: f32[13,2,16,32], index: 1, kind: input, shape index: {}]   ;;  %s988_s2 = inlined_call_operand.hbm [shape: f32[12,2,32], index: 2, kind: output, shape index: {}]  }
   0x1   :  { %996 = sst [smem:[#allocation12_spill]] %s986_s0 }
   0x2   :  { %7 = vsyncpa [#allocation4], 0 }
   0x3   :  { %8 = vsyncpa [#allocation7], 0 }
   0x4   :  { %10 = vsyncpa [#allocation7 + $0x1], 0 }
   0x5   :  { %11 = vsyncpa [#allocation5], 0 }
   0x6   :  { %13 = vsyncpa [#allocation5 + $0x1], 0  ;;  %s717_s9 = smov 0   ;;  %s719_s10 = smov 0  }
   0x7   :  { %s721_s11 = smov 0   ;;  %s723_s12 = smov 0  }
   0x8   :  { %s725_s13 = smov 0   ;;  %s727_s14 = smov 0  }
   0x9   :  { %s729_s15 = smov 0   ;;  %s731_s16 = smov 0  }
   0xa   :  { %s733_s17 = smov 0  }
   0xb LB: > { %s402_s18 = sadd.s32 4294967295, %s693_s17   ;;  %s403_s19 = sadd.s32 4294967294, %s693_s17   ;;  %s693_s17 = sphi %s733_s17, %s19_s17   ;;  %s689_s16 = sphi %s731_s16, %s1021_s16   ;;  %s685_s15 = sphi %s729_s15, %s1020_s15   ;;  %s681_s14 = sphi %s727_s14, %s1019_s14   ;;  %s677_s13 = sphi %s725_s13, %s1018_s13   ;;  %s673_s12 = sphi %s723_s12, %s1017_s12   ;;  %s669_s11 = sphi %s721_s11, %s1016_s11   ;;  %s665_s10 = sphi %s719_s10, %s1015_s10   ;;  %s661_s9 = sphi %s717_s9, %s1014_s9  }
   0xc   : > { %p75_p0 = scmp.ne.s32.totalorder %s681_s14, %s677_s13  ;;  %p76_p1 = scmp.eq.s32.totalorder %s693_s17, 0 }
   0xd   : > { %p81_p2 = scmp.ne.s32.totalorder %s677_s13, %s673_s12  ;;  %p767_p3 = scmp.eq.s32.totalorder %s402_s18, 0 }
   0xe   : > { %s94_s22 = sadd.s32 1, %s669_s11  ;;  %p772_p4 = por %p76_p1, %p75_p0 }
   0xf   : > { %s997_s21 = scalar_select %p767_p3, 1, 0 }
  0x10   : > { %p104_p5 = scmp.ne.s32.totalorder %s669_s11, %s665_s10  ;;  %p780_p6 = por %p767_p3, %p81_p2 }
  0x11   : > { %p105_p7 = scmp.eq.s32.totalorder %s402_s18, 11  ;;  %p110_p8 = scmp.ne.s32.totalorder %s665_s10, %s661_s9 }
  0x12   : > { %s999_s24 = scalar_select %p780_p6, 1, 0 }
  0x13   : > { %p111_p9 = scmp.eq.s32.totalorder %s403_s19, 11  ;;  %p786_p10 = por %p105_p7, %p104_p5 }
  0x14   : > { %p404_p11 = scmp.ge.s32.totalorder %s693_s17, 1  ;;  %p118_p13 = scmp.lt.s32.totalorder %s693_s17, 13 }
  0x15   : > { %s1000_s25 = scalar_select %p786_p10, 1, 0 }
  0x16   : > { %p791_p12 = por %p111_p9, %p110_p8  ;;  %p796_p0 = pnand %p404_p11, %p118_p13 }
  0x17   : > { %s695_s28 = smov [#allocation3]   ;;  %p440_p2 = scmp.lt.s32.totalorder %s693_s17, 12 }
  0x18   : > { %s1001_s26 = scalar_select %p791_p12, 1, 0 }
  0x19   : > { %s1002_s27 = scalar_select %p796_p0, 1, 0 }
  0x1a   : > { %s133_s29 = sshll.u32 %s695_s28, 4  ;;  %p427_p1 = pneg %p796_p0  ;;  %s134_s29 = int_to_ptr.vmem [resolvable:$true] %s133_s29 }
  0x1b   : > { %s995_s30 = sand.u32 1, %s681_s14   ;;  %p812_p7 = pnand %p440_p2, %p772_p4 }
  0x1c   : > { %p806_p5 = pnand %p427_p1, %p767_p3  ;;  %s1005_s0 = sld [smem:[#allocation12_spill]] }
  0x1d   : > { %s1004_s4 = scalar_select %p812_p7, 1, 0 }
  0x1e   : > { %p526_p9 = pneg %p806_p5 }
  0x22   : > { %s524_s7 = scalar_lea.hbm %s1005_s0, 32 }
  0x23   : > { %p525_p8 = scmp.ne.s32.totalorder %s1005_s0, %s524_s7  ;;  %p531_p1 = scmp.lt.u32.totalorder %s524_s7, %s1005_s0 }
  0x25   : > { %p527_p11 = pnand %p526_p9, %p525_p8 }
  0x27   : > { %p528_p13 = pneg %p527_p11 }
  0x29   : > { %p533_p4 = pnand %p531_p1, %p528_p13 }
  0x2b   : > { %536 = shalt.err (!%p533_p4)
}
  0x2c   : > { %s537_s23 = scalar_lea.vmem %s134_s29, 32  ;;  %p545_p6 = scmp.lt.s32.totalorder %s134_s29, %s134_s29 }
  0x2d   : > { %p538_p2 = scmp.ne.s32.totalorder %s134_s29, %s537_s23  ;;  %p546_p3 = scmp.lt.s32.totalorder %s537_s23, %s537_s23 }
  0x2f   : > { %p540_p12 = pnand %p538_p2, %p526_p9  ;;  %p547_p0 = por %p546_p3, %p545_p6 }
  0x31   : > { %p541_p10 = pneg %p540_p12 }
  0x33   : > { %p548_p7 = pnand %p547_p0, %p541_p10 }
  0x35   : > { %551 = shalt.err (!%p548_p7)
}
  0x36   : > { %430 = dma.hbm_to_vmem [thread:$0]  (!%p806_p5), %s1005_s0, 32, %s134_s29, [#allocation4]  }
  0x37   : > { %s31_s6 = sadd.s32 1, %s689_s16  ;;  %s407_s7 = sshll.u32 %s995_s30, 5 }
  0x38   : > { %p33_p3 = scmp.ge.s32.totalorder %s31_s6, 12  ;;  %s418_s8 = sshll.u32 %s689_s16, 9 }
  0x39   : > { %s148_s12 = scalar_lea.vmem [#allocation6], %s407_s7  ;;  %s342_s29 = scalar_lea.hbm %s987_s1, %s418_s8 }
  0x3a   : > { %s158_s3 = sshll.u32 %s148_s12, 4  ;;  %s846_s20 = scalar_lea.hbm %s342_s29, 512  ;;  %s841_s3 = int_to_ptr.vmem [resolvable:$true] %s158_s3 }
  0x3b   : > { %s836_s18 = scalar_select %p33_p3, 0, %s31_s6  }
  0x3c   : > { %s1006_s12 = sadd.s32 1, %s681_s14  ;;  %s1007_s23 = sand.u32 1, %s681_s14  }
  0x3d   : > { %s62_s28 = sadd.s32 1, %s836_s18  ;;  %s91_s5 = ssub.s32 %s689_s16, %s836_s18 }
  0x3e   : > { %s63_s30 = ssub.s32 %s31_s6, %s62_s28  ;;  %p92_p6 = scmp.eq.s32.totalorder %s91_s5, 0 }
  0x3f   : > { %p66_p10 = scmp.eq.s32.totalorder %s63_s30, 0  ;;  %s860_s8 = scalar_lea.sflag [#allocation7], %s1007_s23 }
  0x40   : > { %s851_s7 = scalar_select %p92_p6, %s669_s11, %s94_s22  }
  0x41   : > { %s856_s19 = scalar_select %p66_p10, %s681_s14, %s1006_s12  }
  0x42   : > { %s582_s0 = scalar_lea.hbm %s342_s29, 1024  ;;  %p1008_p0 = scmp.ne.s32.totalorder %s1004_s4, 0 }
  0x43   : > { %p553_p12 = scmp.ne.s32.totalorder %s846_s20, %s582_s0  ;;  %s557_s28 = scalar_lea.hbm %s987_s1, 6656 }
  0x44   : > { %p554_p5 = pneg %p1008_p0  ;;  %p558_p9 = scmp.lt.u32.totalorder %s846_s20, %s987_s1 }
  0x45   : > { %p559_p11 = scmp.lt.u32.totalorder %s557_s28, %s582_s0  ;;  %p561_p1 = scmp.lt.u32.totalorder %s582_s0, %s846_s20 }
  0x46   : > { %p555_p7 = pnand %p554_p5, %p553_p12 }
  0x47   : > { %p560_p13 = por %p559_p11, %p558_p9 }
  0x48   : > { %p556_p8 = pneg %p555_p7 }
  0x49   : > { %p562_p4 = por %p561_p1, %p560_p13 }
  0x4b   : > { %p563_p2 = pnand %p562_p4, %p556_p8 }
  0x4d   : > { %566 = shalt.err (!%p563_p2)
}
  0x4e   : > { %s567_s29 = scalar_lea.vmem %s841_s3, 512  ;;  %s696_s12 = smov [#allocation6]  }
  0x4f   : > { %p568_p3 = scmp.ne.s32.totalorder %s841_s3, %s567_s29  ;;  %s572_s23 = sshll.u32 %s696_s12, 4  ;;  %s573_s23 = int_to_ptr.vmem [resolvable:$false] %s572_s23 }
  0x50   : > { %s574_s30 = scalar_lea.vmem %s573_s23, 1024  ;;  %p575_p12 = scmp.lt.s32.totalorder %s841_s3, %s573_s23 }
  0x51   : > { %p570_p6 = pnand %p568_p3, %p554_p5  ;;  %p576_p7 = scmp.lt.s32.totalorder %s574_s30, %s567_s29 }
  0x53   : > { %p571_p10 = pneg %p570_p6  ;;  %p577_p9 = por %p576_p7, %p575_p12 }
  0x55   : > { %p578_p11 = pnand %p577_p9, %p571_p10 }
  0x57   : > { %581 = shalt.err (!%p578_p11)
}
  0x58   : > { %s697_s0 = smov 128   ;;  %s698_s6 = smov 8  }
  0x59   : > { %434 = dma.hbm_to_vmem [thread:$0]  (!%p1008_p0), %s846_s20, 512, %s841_s3, %s860_s8, %s697_s0, %s697_s0, %s698_s6  }
  0x5a   : > { %p1009_p5 = scmp.ne.s32.totalorder %s1002_s27, 0 }
  0x5b   : > { %p1010_p8 = scmp.ne.s32.totalorder (!%p1009_p5), %s997_s21, 0 }
  0x5c   : > { %170 = sbr.rel (%p1009_p5) target bundleno = 415 (0x19f), region = 28 }
  0x63   : > { %648 = dma.done.wait (%p1010_p8), [#allocation4], 32  }
  0x64   : > { %650 = vsyncadd (%p1010_p8), [#allocation4], 4294967264  ;;  %s176_s28 = sand.u32 1, %s677_s13   ;;  %p1011_p13 = scmp.ne.s32.totalorder %s999_s24, 0 }
  0x65   : > { %s412_s22 = sshll.u32 %s176_s28, 5  ;;  %s177_s5 = scalar_lea.sflag [#allocation7], %s176_s28 }
  0x66   : > { %s894_s29 = scalar_lea.vmem [#allocation6], %s412_s22 }
  0x67   : > { %652 = dma.done.wait (%p1011_p13), %s177_s5, 512  }
  0x68   : > { %654 = vsyncadd (%p1011_p13), %s177_s5, 4294966784  ;;  %v217_v0 = vlaneseq  ;;  %vm209_vm0 = vcmask 1024   ;;  %v699_v1 = vmov 0.0   ;;  %vm271_vm1 = vcmask 123904   ;;  %v211_v5 = vld [vmem:[#allocation3] sm:$0x3] }
  0x69   : > { %210 = vst.msk [vmem:[#allocation2] sm:$0x3] %vm209_vm0, %v699_v1  ;;  %v272_v6 = vsel %vm271_vm1, %v211_v5, 0.0  ;;  %v700_v9 = vmov 0   ;;  %v214_v12 = vld [vmem:[%s894_s29 + $0x10] sm:$0xff]  ;;  %v215_v13 = vld [vmem:[%s894_s29 + $0x18] sm:$0xff] }
  0x6a   : > { %v218_v2 = vshrl.u32 %v217_v0, 7  ;;  %273 = vadd.xlane.f32.xlu0 %v272_v6  ;;  %520 = vset.pattern.permute.xlu1 %v700_v9  ;;  %vm243_vm2 = vcmask 261120   ;;  %s198_s20 = sand.u32 1, %s665_s10   ;;  %vm207_vm3 = vcmask 254976   ;;  %v213_v21 = vld [vmem:[%s894_s29 + $0x8] sm:$0xff]  ;;  %v212_v27 = vld [vmem:[%s894_s29] sm:$0xff] }
  0x6b   : > { %521 = vset.pattern.permute.xlu0 %v700_v9  ;;  %s413_s21 = sshll.u32 %s198_s20, 1  ;;  %vm264_vm4 = vcmask 1041409   ;;  %s415_s27 = sshll.u32 %s685_s15, 5 }
  0x6c   : > { %v219_v3 = vsub.s32 0, %v218_v2  ;;  %v230_v4 = vsub.s32 1, %v218_v2  ;;  %s908_s24 = scalar_lea.vmem [#allocation8], %s413_s21  ;;  %s926_s12 = scalar_lea.hbm %s988_s2, %s415_s27 }
  0x6d   : > { %208 = vst.msk [vmem:[%s908_s24] sm:$0x3] %vm207_vm3, %v699_v1  ;;  %s306_s4 = sshll.u32 %s908_s24, 4  ;;  %s293_s23 = scalar_lea.sflag [#allocation5], %s198_s20  ;;  %s928_s4 = int_to_ptr.vmem [resolvable:$true] %s306_s4 }
  0x6e   : > { %v220_v7 = vrot.slane %v211_v5, %v219_v3  ;;  %v231_v8 = vrot.slane %v211_v5, %v230_v4  ;;  %s583_s30 = scalar_lea.vmem %s928_s4, 32  ;;  %p1012_p1 = scmp.ne.s32.totalorder %s1000_s25, 0 }
  0x6f   : > { %p584_p0 = scmp.ne.s32.totalorder %s928_s4, %s583_s30  ;;  %s701_s15 = smov [#allocation8]  }
  0x70   : > { %226 = vbcast.lane.b32.xlu1 %v220_v7, 264  ;;  %v270_v20 = vld [vmem:[#allocation2] sm:$0x3]  ;;  %s587_s0 = sshll.u32 %s701_s15, 4  ;;  %s588_s0 = int_to_ptr.vmem [resolvable:$false] %s587_s0 }
  0x71   : > { %p585_p4 = pnand %p584_p0, %p1012_p1  ;;  %s589_s6 = scalar_lea.vmem %s588_s0, 64 }
  0x72   : > { %p590_p3 = scmp.lt.s32.totalorder %s928_s4, %s588_s0  ;;  %p591_p6 = scmp.lt.s32.totalorder %s589_s6, %s583_s30 }
  0x73   : > { %p586_p2 = pneg %p585_p4 }
  0x74   : > { %233 = vbcast.lane.b32.xlu1 %v231_v8, 256  ;;  %v216_v45 = vld [vmem:[%s908_s24] sm:$0x3]  ;;  %p592_p10 = por %p591_p6, %p590_p3 }
  0x76   : > { %p593_p12 = pnand %p592_p10, %p586_p2 }
  0x78   : > { %237 = vbcast.lane.b32.xlu1 %v231_v8, 264 }
  0x80   : > { %222 = vbcast.lane.b32.xlu0 %v220_v7, 256 }
  0xe2   : > { %v227_v10 = vpop.permute.xlu1 %226 }
  0xe3   : > { %v240_v25 = vmul.f32 %v227_v10, %v213_v21 }
  0xe5   : > { %v245_v29 = vsel %vm243_vm2, %v240_v25, 0.0 }
  0xe6   : > { %v234_v11 = vpop.permute.xlu1 %233 }
  0xe7   : > { %v241_v15 = vmul.f32 %v234_v11, %v214_v12 }
  0xe9   : > { %v253_v17 = vsel %vm243_vm2, %v241_v15, 0.0 }
  0xea   : > { %v238_v14 = vpop.permute.xlu1 %237 }
  0xeb   : > { %v242_v16 = vmul.f32 %v238_v14, %v215_v13 }
  0xed   : > { %v254_v18 = vsel %vm243_vm2, %v242_v16, 0.0 }
  0xee   : > { %v255_v19 = vadd.f32 %v254_v18, %v253_v17 }
  0xf0   : > { %v256_v22 = vrot.slane %v255_v19, 4 }
  0xf2   : > { %v257_v26 = vadd.f32 %v256_v22, %v255_v19 }
  0xf4   : > { %v258_v31 = vrot.slane %v257_v26, 2 }
  0xf6   : > { %v259_v35 = vadd.f32 %v258_v31, %v257_v26 }
  0xf7   : > { %v274_v23 = vpop.xlane.xlu0 %273 }
  0xf8   : > { %v275_v24 = vadd.f32 %v274_v23, %v270_v20  ;;  %v260_v39 = vrot.slane %v259_v35, 1 }
  0xfa   : > { %277 = vst.msk [vmem:[#allocation2] sm:$0x3] %vm209_vm0, %v275_v24  ;;  %v261_v42 = vadd.f32 %v260_v39, %v259_v35 }
  0xfb   : > { %v223_v28 = vpop.permute.xlu0 %222 }
  0xfc   : > { %v239_v30 = vmul.f32 %v223_v28, %v212_v27 }
  0xfe   : > { %v244_v32 = vsel %vm243_vm2, %v239_v30, 0.0 }
  0xff   : > { %v246_v33 = vadd.f32 %v245_v29, %v244_v32 }
 0x101   : > { %v281_v34 = vld [vmem:[#allocation2] sm:$0x3]  ;;  %v247_v36 = vrot.slane %v246_v33, 4 }
 0x102   : > { %v282_v37 = vmax.f32 %v281_v34, 0.0 }
 0x103   : > { %v248_v38 = vadd.f32 %v247_v36, %v246_v33 }
 0x104   : > { %286 = vperm.xlu1 %520, %v282_v37  }
 0x105   : > { %v249_v40 = vrot.slane %v248_v38, 2 }
 0x107   : > { %v250_v41 = vadd.f32 %v249_v40, %v248_v38 }
 0x109   : > { %v251_v43 = vrot.slane %v250_v41, 1 }
 0x10b   : > { %v252_v44 = vadd.f32 %v251_v43, %v250_v41 }
 0x10d   : > { %v265_v46 = vsel %vm264_vm4, %v261_v42, %v252_v44 }
 0x10e   : > { %v267_v47 = vadd.f32 %v265_v46, %v216_v45 }
 0x110   : > { %269 = vst.msk [vmem:[%s908_s24] sm:$0x3] %vm207_vm3, %v267_v47 }
 0x117   : > { %v283_v50 = vld [vmem:[%s908_s24] sm:$0x3] }
 0x183   : > { %v287_v48 = vpop.permute.xlu1 %286 }
 0x184   : > { %522 = vrcp.f32 %v287_v48 }
 0x18e   : > { %v523_v49 = vpop.eup %522 }
 0x18f   : > { %v290_v51 = vmul.f32 %v523_v49, %v283_v50 }
 0x191   : > { %291 = vst.msk [vmem:[%s908_s24] sm:$0x3] %vm207_vm3, %v290_v51 }
 0x192   : > { %596 = shalt.err (!%p593_p12)
}
 0x193   : > { %s597_s28 = scalar_lea.hbm %s926_s12, 32  ;;  %s601_s29 = scalar_lea.hbm %s988_s2, 384 }
 0x194   : > { %p598_p7 = scmp.ne.s32.totalorder %s926_s12, %s597_s28  ;;  %p602_p5 = scmp.lt.u32.totalorder %s926_s12, %s988_s2 }
 0x195   : > { %p603_p8 = scmp.lt.u32.totalorder %s601_s29, %s597_s28  ;;  %p605_p0 = scmp.lt.u32.totalorder %s597_s28, %s926_s12 }
 0x196   : > { %p599_p9 = pnand %p598_p7, %p1012_p1 }
 0x197   : > { %p604_p13 = por %p603_p8, %p602_p5 }
 0x198   : > { %p600_p11 = pneg %p599_p9 }
 0x199   : > { %p606_p4 = por %p605_p0, %p604_p13 }
 0x19b   : > { %p607_p2 = pnand %p606_p4, %p600_p11 }
 0x19d   : > { %610 = shalt.err (!%p607_p2)
}
 0x19e   : > { %425 = dma.vmem_to_hbm [thread:$0]  (%p1012_p1), %s928_s4, 32, %s926_s12, %s293_s23  }
 0x19f PF: > { %p442_p3 = scmp.ge.s32.totalorder %s693_s17, 2  ;;  %s318_s24 = sand.u32 1, %s661_s9  }
 0x1a0   : > { %p1013_p6 = scmp.ne.s32.totalorder %s1001_s26, 0  ;;  %s319_s27 = scalar_lea.sflag [#allocation5], %s318_s24 }
 0x1a2   : > { %p436_p10 = pnand %p442_p3, %p1013_p6 }
 0x1a4   : > { %656 = dma.done.wait (!%p436_p10), %s319_s27, 32  }
 0x1a5   : > { %658 = vsyncadd (!%p436_p10), %s319_s27, 4294967264  ;;  %s19_s17 = sadd.s32 1, %s693_s17   ;;  %s1014_s9 = smov %s665_s10 }
 0x1a6   : > { %p16_p12 = scmp.ge.s32.totalorder %s19_s17, 14   ;;  %s1015_s10 = smov %s669_s11 }
 0x1a7   : > { %s1016_s11 = smov %s851_s7  ;;  %s1017_s12 = smov %s677_s13 }
 0x1a8   : > { %s1018_s13 = smov %s681_s14  ;;  %s1019_s14 = smov %s856_s19 }
 0x1a9   : > { %s1020_s15 = smov %s689_s16  ;;  %s1021_s16 = smov %s836_s18 }
 0x1aa   :  { %18 = sbr.rel (!%p16_p12) target bundleno = 11 (0xb), region = 87 }
 0x1b1   :  { %324 = vsyncpa [#allocation4], 1 }
 0x1b2   :  { %326 = vsyncpa [#allocation4 + $0x1], 1 }
 0x1b3   :  { %327 = vsyncpa [#allocation7], 1 }
 0x1b4   :  { %329 = vsyncpa [#allocation7 + $0x1], 1 }
 0x1b5   :  { %330 = vsyncpa [#allocation5], 1 }
 0x1b6   :  { %332 = vsyncpa [#allocation5 + $0x1], 1 }

</bundles_post_ra>
